<compile_context>
chip_gen: v7x
topology: tpu7x:2x2x1
jax: 0.10.0
libtpu: 0.0.40
codegen_flags: <defaults>
</compile_context>

<pallas_src>
import jax
import jax.numpy as jnp
from jax.experimental import pallas as pl
from jax.experimental.pallas import tpu as pltpu

IN_DIM = 25
IN_PAD = 32          # zero-pad K from 25 -> 32 for clean (8,128) tiling
H1 = 128
H2 = 64
OUT_DIM = 4
LANE = 128


def mlp_kernel(x_ref, w1_ref, b1_ref, w2_ref, b2_ref, w3_ref, b3_ref, o_ref):
    # All operands are transposed: x_ref (IN_PAD, bn), w_i (out_i, in_i),
    # biases (out_i, 1), o_ref (OUT_DIM, bn).  Batch is the lane dimension.
    cdt = w1_ref.dtype  # matmul operand dtype (f32 or bf16); accumulation is f32.

    # layer1 + relu : (H1, IN_PAD) @ (IN_PAD, bn) -> (H1, bn)
    h1 = jnp.dot(w1_ref[...], x_ref[...],
                 preferred_element_type=jnp.float32) + b1_ref[...]
    h1 = jnp.maximum(h1, 0.0)

    # layer2 + sigmoid : (H2, H1) @ (H1, bn) -> (H2, bn)
    h2 = jnp.dot(w2_ref[...], h1.astype(cdt),
                 preferred_element_type=jnp.float32) + b2_ref[...]
    h2 = jax.nn.sigmoid(h2)

    # layer3 (no activation) : (OUT_DIM, H2) @ (H2, bn) -> (OUT_DIM, bn)
    y = jnp.dot(w3_ref[...], h2.astype(cdt),
                preferred_element_type=jnp.float32) + b3_ref[...]

    # Lane-dense store: last dim is bn (multiple of 128) -> unmasked vst.
    o_ref[...] = y.astype(o_ref.dtype)


def sliding_window_forward(x, params, *, bn=512, operand_dtype=None):
    """Pallas forward pass. `params` are in nn.Linear-equivalent layout:
    w_i: (fan_in, fan_out), b_i: (1, fan_out).  `bn` is the batch tile
    (lane dim), clamped to a multiple of 128.  `operand_dtype` optionally casts
    the matmul operands (e.g. jnp.bfloat16); accumulation stays f32."""
    w1, b1, w2, b2, w3, b3 = params
    B = x.shape[0]
    out_dtype = x.dtype
    cdt = operand_dtype if operand_dtype is not None else x.dtype

    # Batch tile: multiple of 128, no bigger than the padded batch.
    bn = max(LANE, min(int(bn) // LANE * LANE, pl.cdiv(B, LANE) * LANE))
    B_pad = pl.cdiv(B, bn) * bn

    # One-time layout plumbing in the wrapper (transpose + zero padding).
    x_t = jnp.pad(x, ((0, B_pad - B), (0, IN_PAD - IN_DIM))).T.astype(cdt)   # (32, B_pad)
    w1_t = jnp.pad(w1, ((0, IN_PAD - IN_DIM), (0, 0))).T.astype(cdt)         # (128, 32)
    w2_t = w2.T.astype(cdt)                                                   # (64, 128)
    w3_t = w3.T.astype(cdt)                                                   # (4, 64)
    b1_t = b1.reshape(H1, 1).astype(jnp.float32)
    b2_t = b2.reshape(H2, 1).astype(jnp.float32)
    b3_t = b3.reshape(OUT_DIM, 1).astype(jnp.float32)

    grid = (B_pad // bn,)
    # Weights/biases are tiny (<100 KiB total): broadcast full blocks each step.
    # (On v7x one could add pipeline_mode=pl.Buffered(1) here to save a little
    #  VMEM; footprint is already far below the scoped limit, so it is omitted.)
    full = lambda shape: pl.BlockSpec(shape, lambda i: (0, 0))

    out_t = pl.pallas_call(
        mlp_kernel,
        out_shape=jax.ShapeDtypeStruct((OUT_DIM, B_pad), jnp.float32),
        grid_spec=pltpu.PrefetchScalarGridSpec(
            num_scalar_prefetch=0,
            grid=grid,
            in_specs=[
                pl.BlockSpec((IN_PAD, bn), lambda i: (0, i)),   # x_t, tiled over batch
                full((H1, IN_PAD)), full((H1, 1)),
                full((H2, H1)), full((H2, 1)),
                full((OUT_DIM, H2)), full((OUT_DIM, 1)),
            ],
            out_specs=pl.BlockSpec((OUT_DIM, bn), lambda i: (0, i)),
        ),
        compiler_params=pltpu.CompilerParams(
            dimension_semantics=("parallel",)),
    )(x_t, w1_t, b1_t, w2_t, b2_t, w3_t, b3_t)

    # Back to the module's (B, 4) layout; drop batch padding.
    return out_t[:, :B].T.astype(out_dtype)


def init_params(key):
    """Deterministic PyTorch-style (uniform +/- 1/sqrt(fan_in)) init,
    stored as (fan_in, fan_out) so y = x @ W + b matches nn.Linear."""
    ks = jax.random.split(key, 6)

    def linear(kw, kb, fan_in, fan_out):
        bound = 1.0 / jnp.sqrt(fan_in)
        w = jax.random.uniform(kw, (fan_in, fan_out), jnp.float32, -bound, bound)
        b = jax.random.uniform(kb, (1, fan_out), jnp.float32, -bound, bound)
        return w, b

    w1, b1 = linear(ks[0], ks[1], IN_DIM, H1)
    w2, b2 = linear(ks[2], ks[3], H1, H2)
    w3, b3 = linear(ks[4], ks[5], H2, OUT_DIM)
    return (w1, b1, w2, b2, w3, b3)


def reference_forward(x, params):
    w1, b1, w2, b2, w3, b3 = params
    h1 = jnp.maximum(x @ w1 + b1, 0.0)
    h2 = jax.nn.sigmoid(h1 @ w2 + b2)
    return h2 @ w3 + b3


if __name__ == "__main__":
    key = jax.random.PRNGKey(0)
    kx, kp = jax.random.split(key)

    B = 8
    x = jax.random.normal(kx, (B, IN_DIM), jnp.float32)
    params = init_params(kp)
    ref = reference_forward(x, params)

    # f32 path (exact semantics of the PyTorch module).
    fwd = jax.jit(sliding_window_forward)
    out = jax.block_until_ready(fwd(x, params))
    assert out.shape == (B, OUT_DIM), out.shape
    assert jnp.allclose(out, ref, atol=1e-5, rtol=1e-5), "mismatch vs reference (f32)"

    # bf16-operand path (bandwidth-optimized for v6e/v7x; f32 accumulation).
    out_bf16 = jax.block_until_ready(
        sliding_window_forward(x, params, operand_dtype=jnp.bfloat16))
    assert out_bf16.shape == (B, OUT_DIM), out_bf16.shape
    assert jnp.allclose(out_bf16, ref, atol=5e-2, rtol=5e-2), "mismatch vs reference (bf16)"

    print("KERNEL_OK")
</pallas_src>

<mosaic_0001>
module attributes {stable_mosaic.version = 11 : i64} {
  func.func @mlp_kernel(%arg0: i32, %arg1: memref<32x128xf32, #tpu.memory_space<vmem>>, %arg2: memref<128x32xf32, #tpu.memory_space<vmem>>, %arg3: memref<128x1xf32, #tpu.memory_space<vmem>>, %arg4: memref<64x128xf32, #tpu.memory_space<vmem>>, %arg5: memref<64x1xf32, #tpu.memory_space<vmem>>, %arg6: memref<4x64xf32, #tpu.memory_space<vmem>>, %arg7: memref<4x1xf32, #tpu.memory_space<vmem>>, %arg8: memref<4x128xf32, #tpu.memory_space<vmem>>) attributes {dimension_semantics = [#tpu.dimension_semantics<parallel>], iteration_bounds = array<i64: 1>, scalar_prefetch = 0 : i64, scratch_operands = 0 : i64, tpu.core_type = #tpu.core_type<tc>, window_params = [{transform_indices = @transform_0, window_bounds = array<i64: 32, 128>}, {pipeline_mode = #tpu.pipeline_mode<synchronous>, transform_indices = @transform_1, window_bounds = array<i64: 128, 32>}, {pipeline_mode = #tpu.pipeline_mode<synchronous>, transform_indices = @transform_2, window_bounds = array<i64: 128, 1>}, {pipeline_mode = #tpu.pipeline_mode<synchronous>, transform_indices = @transform_3, window_bounds = array<i64: 64, 128>}, {pipeline_mode = #tpu.pipeline_mode<synchronous>, transform_indices = @transform_4, window_bounds = array<i64: 64, 1>}, {pipeline_mode = #tpu.pipeline_mode<synchronous>, transform_indices = @transform_5, window_bounds = array<i64: 4, 64>}, {pipeline_mode = #tpu.pipeline_mode<synchronous>, transform_indices = @transform_6, window_bounds = array<i64: 4, 1>}, {transform_indices = @transform_7, window_bounds = array<i64: 4, 128>}]} {
    %c0 = arith.constant 0 : index
    %c0_0 = arith.constant 0 : index
    %0 = vector.load %arg2[%c0, %c0_0] : memref<128x32xf32, #tpu.memory_space<vmem>>, vector<128x32xf32>
    %c0_1 = arith.constant 0 : index
    %c0_2 = arith.constant 0 : index
    %1 = vector.load %arg1[%c0_1, %c0_2] : memref<32x128xf32, #tpu.memory_space<vmem>>, vector<32x128xf32>
    %cst = arith.constant dense<0.000000e+00> : vector<128x128xf32>
    %2 = tpu.matmul %0, %1, %cst {dimension_numbers = #tpu.dot_dimension_numbers<[1], [0], [0], [1], [0, 0, 1, 1], [], []>} : vector<128x32xf32>, vector<32x128xf32>, vector<128x128xf32> -> vector<128x128xf32>
    %c0_3 = arith.constant 0 : index
    %c0_4 = arith.constant 0 : index
    %3 = vector.load %arg3[%c0_3, %c0_4] : memref<128x1xf32, #tpu.memory_space<vmem>>, vector<128x1xf32>
    %4 = vector.broadcast %3 : vector<128x1xf32> to vector<128x128xf32>
    %5 = arith.addf %2, %4 : vector<128x128xf32>
    %cst_5 = arith.constant 0.000000e+00 : f32
    %6 = vector.broadcast %cst_5 : f32 to vector<128x128xf32>
    %7 = arith.maximumf %5, %6 : vector<128x128xf32>
    %c0_6 = arith.constant 0 : index
    %c0_7 = arith.constant 0 : index
    %8 = vector.load %arg4[%c0_6, %c0_7] : memref<64x128xf32, #tpu.memory_space<vmem>>, vector<64x128xf32>
    %cst_8 = arith.constant dense<0.000000e+00> : vector<64x128xf32>
    %9 = tpu.matmul %8, %7, %cst_8 {dimension_numbers = #tpu.dot_dimension_numbers<[1], [0], [0], [1], [0, 0, 1, 1], [], []>} : vector<64x128xf32>, vector<128x128xf32>, vector<64x128xf32> -> vector<64x128xf32>
    %c0_9 = arith.constant 0 : index
    %c0_10 = arith.constant 0 : index
    %10 = vector.load %arg5[%c0_9, %c0_10] : memref<64x1xf32, #tpu.memory_space<vmem>>, vector<64x1xf32>
    %11 = vector.broadcast %10 : vector<64x1xf32> to vector<64x128xf32>
    %12 = arith.addf %9, %11 : vector<64x128xf32>
    %13 = arith.negf %12 : vector<64x128xf32>
    %14 = math.exp %13 : vector<64x128xf32>
    %cst_11 = arith.constant 1.000000e+00 : f32
    %15 = vector.broadcast %cst_11 : f32 to vector<64x128xf32>
    %16 = arith.addf %15, %14 : vector<64x128xf32>
    %17 = arith.divf %15, %16 : vector<64x128xf32>
    %c0_12 = arith.constant 0 : index
    %c0_13 = arith.constant 0 : index
    %18 = vector.load %arg6[%c0_12, %c0_13] : memref<4x64xf32, #tpu.memory_space<vmem>>, vector<4x64xf32>
    %cst_14 = arith.constant dense<0.000000e+00> : vector<4x128xf32>
    %19 = tpu.matmul %18, %17, %cst_14 {dimension_numbers = #tpu.dot_dimension_numbers<[1], [0], [0], [1], [0, 0, 1, 1], [], []>} : vector<4x64xf32>, vector<64x128xf32>, vector<4x128xf32> -> vector<4x128xf32>
    %c0_15 = arith.constant 0 : index
    %c0_16 = arith.constant 0 : index
    %20 = vector.load %arg7[%c0_15, %c0_16] : memref<4x1xf32, #tpu.memory_space<vmem>>, vector<4x1xf32>
    %21 = vector.broadcast %20 : vector<4x1xf32> to vector<4x128xf32>
    %22 = arith.addf %19, %21 : vector<4x128xf32>
    %c0_17 = arith.constant 0 : index
    %c0_18 = arith.constant 0 : index
    %23 = vector.load %arg8[%c0_17, %c0_18] : memref<4x128xf32, #tpu.memory_space<vmem>>, vector<4x128xf32>
    tpu.vector_store %arg8[%c0_17, %c0_18], %22 {strides = array<i32>} : memref<4x128xf32, #tpu.memory_space<vmem>>, vector<4x128xf32>,
    return
  }
  func.func @transform_0(%arg0: i32) -> (i32, i32) {
    %c0_i32 = arith.constant 0 : i32
    %c0_i32_0 = arith.constant 0 : i32
    return %c0_i32, %arg0 : i32, i32
  }
  func.func @transform_1(%arg0: i32) -> (i32, i32) {
    %c0_i32 = arith.constant 0 : i32
    %c0_i32_0 = arith.constant 0 : i32
    %c0_i32_1 = arith.constant 0 : i32
    return %c0_i32, %c0_i32_0 : i32, i32
  }
  func.func @transform_2(%arg0: i32) -> (i32, i32) {
    %c0_i32 = arith.constant 0 : i32
    %c0_i32_0 = arith.constant 0 : i32
    %c0_i32_1 = arith.constant 0 : i32
    return %c0_i32, %c0_i32_0 : i32, i32
  }
  func.func @transform_3(%arg0: i32) -> (i32, i32) {
    %c0_i32 = arith.constant 0 : i32
    %c0_i32_0 = arith.constant 0 : i32
    %c0_i32_1 = arith.constant 0 : i32
    return %c0_i32, %c0_i32_0 : i32, i32
  }
  func.func @transform_4(%arg0: i32) -> (i32, i32) {
    %c0_i32 = arith.constant 0 : i32
    %c0_i32_0 = arith.constant 0 : i32
    %c0_i32_1 = arith.constant 0 : i32
    return %c0_i32, %c0_i32_0 : i32, i32
  }
  func.func @transform_5(%arg0: i32) -> (i32, i32) {
    %c0_i32 = arith.constant 0 : i32
    %c0_i32_0 = arith.constant 0 : i32
    %c0_i32_1 = arith.constant 0 : i32
    return %c0_i32, %c0_i32_0 : i32, i32
  }
  func.func @transform_6(%arg0: i32) -> (i32, i32) {
    %c0_i32 = arith.constant 0 : i32
    %c0_i32_0 = arith.constant 0 : i32
    %c0_i32_1 = arith.constant 0 : i32
    return %c0_i32, %c0_i32_0 : i32, i32
  }
  func.func @transform_7(%arg0: i32) -> (i32, i32) {
    %c0_i32 = arith.constant 0 : i32
    %c0_i32_0 = arith.constant 0 : i32
    return %c0_i32, %arg0 : i32, i32
  }
}

</mosaic_0001>

<bundles_post_ra>
// kernel: sliding_window_forward.1
= control target key start
LH: loop header
LB: loop body
LE: loop exit
PB: predicated region body
PF: predicated region fallthrough
CT: control target
= control target key end

     0   :  { %vm142_vm0 = vcmask 261120   ;;  %v910_v3 = vmov 0   ;;  %vm912_vm1 = vmmov 0   ;;  %vm568_vm2 = vcmask 523264   ;;  %s1139_s0 = inlined_call_operand.vmem [shape: f32[32,128], index: 0, kind: input, shape index: {}]   ;;  %s1140_s1 = inlined_call_operand.vmem [shape: f32[128,32], index: 1, kind: input, shape index: {}]   ;;  %s1141_s2 = inlined_call_operand.vmem [shape: f32[128,1], index: 2, kind: input, shape index: {}]   ;;  %s1142_s4 = inlined_call_operand.vmem [shape: f32[64,1], index: 4, kind: input, shape index: {}]   ;;  %s1143_s6 = inlined_call_operand.vmem [shape: f32[4,1], index: 6, kind: input, shape index: {}]   ;;  %s1144_s3 = inlined_call_operand.vmem [shape: f32[64,128], index: 3, kind: input, shape index: {}]   ;;  %s1145_s5 = inlined_call_operand.vmem [shape: f32[4,64], index: 5, kind: input, shape index: {}]   ;;  %s1146_s7 = inlined_call_operand.vmem [shape: f32[4,128], index: 7, kind: output, shape index: {}]  }
   0x1   :  { %v42_v0 = vld [vmem:[%s1139_s0] sm:$0xff]  ;;  %v43_v1 = vld [vmem:[%s1139_s0 + $0x8] sm:$0xff]  ;;  %v44_v2 = vld [vmem:[%s1139_s0 + $0x10] sm:$0xff]  ;;  %876 = vset.pattern.permute.xlu0 %v910_v3  ;;  %877 = vset.pattern.permute.xlu1 %v910_v3 }
   0x2   :  { %v820_v4 = vpack.c.bf16 %v43_v1, %v42_v0  ;;  %v45_v5 = vld [vmem:[%s1139_s0 + $0x18] sm:$0xff]  ;;  %v26_v6 = vld [vmem:[%s1140_s1] sm:$0xff]  ;;  %v48_v9 = vld [vmem:[%s1141_s2 + $0x10] sm:$0xff] }
   0x3   :  { %v824_v7 = vpack.c.bf16 %v45_v5, %v44_v2  ;;  %733 = vmatprep.mubr.msk.f32.mxu0 %vm142_vm0, %v26_v6  ;;  %v46_v8 = vld [vmem:[%s1141_s2] sm:$0xff]  ;;  %v27_v10 = vld [vmem:[%s1140_s1 + $0x8] sm:$0xff]  ;;  %74 = vperm.xlu1 %877, %v48_v9   ;;  %v28_v12 = vld [vmem:[%s1140_s1 + $0x10] sm:$0xff] }
   0x4   :  { %821 = vmatprep.subr.bf16.mxu0 %v820_v4  ;;  %64 = vperm.xlu0 %876, %v46_v8   ;;  %v47_v11 = vld [vmem:[%s1141_s2 + $0x8] sm:$0xff]  ;;  %v49_v13 = vld [vmem:[%s1141_s2 + $0x18] sm:$0xff]  ;;  %v50_v15 = vld [vmem:[%s1141_s2 + $0x20] sm:$0xff] }
   0x5   :  { %823 = vmatpush3.bf16.msra.mxu0 %v820_v4  ;;  %v29_v14 = vld [vmem:[%s1140_s1 + $0x18] sm:$0xff]  ;;  %v30_v16 = vld [vmem:[%s1140_s1 + $0x20] sm:$0xff]  ;;  %v51_v17 = vld [vmem:[%s1141_s2 + $0x28] sm:$0xff] }
   0x6   :  { %825 = vmatprep.subr.bf16.mxu0 %v824_v7  ;;  %v31_v18 = vld [vmem:[%s1140_s1 + $0x28] sm:$0xff]  ;;  %v52_v19 = vld [vmem:[%s1141_s2 + $0x30] sm:$0xff]  ;;  %v53_v21 = vld [vmem:[%s1141_s2 + $0x38] sm:$0xff] }
   0x7   :  { %79 = vperm.xlu1 %877, %v49_v13   ;;  %v32_v20 = vld [vmem:[%s1140_s1 + $0x30] sm:$0xff]  ;;  %v33_v22 = vld [vmem:[%s1140_s1 + $0x38] sm:$0xff]  ;;  %v54_v23 = vld [vmem:[%s1141_s2 + $0x40] sm:$0xff] }
   0x8   :  { %69 = vperm.xlu0 %876, %v47_v11   ;;  %v34_v24 = vld [vmem:[%s1140_s1 + $0x40] sm:$0xff]  ;;  %v55_v25 = vld [vmem:[%s1141_s2 + $0x48] sm:$0xff]  ;;  %v56_v27 = vld [vmem:[%s1141_s2 + $0x50] sm:$0xff] }
   0x9   :  { %827 = vmatpush3.bf16.msra.mxu0 %v824_v7  ;;  %v35_v26 = vld [vmem:[%s1140_s1 + $0x48] sm:$0xff]  ;;  %v36_v28 = vld [vmem:[%s1140_s1 + $0x50] sm:$0xff]  ;;  %v57_v29 = vld [vmem:[%s1141_s2 + $0x58] sm:$0xff] }
   0xa   :  { %v37_v30 = vld [vmem:[%s1140_s1 + $0x58] sm:$0xff]  ;;  %v58_v31 = vld [vmem:[%s1141_s2 + $0x60] sm:$0xff]  ;;  %v59_v33 = vld [vmem:[%s1141_s2 + $0x68] sm:$0xff] }
   0xb   :  { %89 = vperm.xlu1 %877, %v51_v17   ;;  %v38_v32 = vld [vmem:[%s1140_s1 + $0x60] sm:$0xff]  ;;  %v39_v34 = vld [vmem:[%s1140_s1 + $0x68] sm:$0xff]  ;;  %v60_v35 = vld [vmem:[%s1141_s2 + $0x70] sm:$0xff] }
   0xc   :  { %734 = vmatmul.mubr.msk.f32.vlgmr.msra.gmra.mrb[0].mxu0 %vm142_vm0, %v27_v10  ;;  %84 = vperm.xlu0 %876, %v50_v15   ;;  %v40_v36 = vld [vmem:[%s1140_s1 + $0x70] sm:$0xff]  ;;  %v61_v37 = vld [vmem:[%s1141_s2 + $0x78] sm:$0xff]  ;;  %v360_v39 = vld [vmem:[%s1142_s4] sm:$0xff] }
   0xd   :  { %736 = vmatprep.mubr.msk.f32.mxu0 %vm142_vm0, %v28_v12  ;;  %v41_v38 = vld [vmem:[%s1140_s1 + $0x78] sm:$0xff]  ;;  %v361_v40 = vld [vmem:[%s1142_s4 + $0x8] sm:$0xff]  ;;  %v362_v41 = vld [vmem:[%s1142_s4 + $0x10] sm:$0xff] }
   0xe   :  { %v363_v42 = vld [vmem:[%s1142_s4 + $0x18] sm:$0xff]  ;;  %v364_v43 = vld [vmem:[%s1142_s4 + $0x20] sm:$0xff]  ;;  %v365_v44 = vld [vmem:[%s1142_s4 + $0x28] sm:$0xff] }
   0xf   :  { %99 = vperm.xlu1 %877, %v53_v21   ;;  %v366_v45 = vld [vmem:[%s1142_s4 + $0x30] sm:$0xff]  ;;  %v367_v46 = vld [vmem:[%s1142_s4 + $0x38] sm:$0xff]  ;;  %v562_v47 = vld [vmem:[%s1143_s6] sm:$0xf] }
  0x10   :  { %737 = vmatmul.mubr.msk.f32.gmra.mrb[2].mxu0 %vm142_vm0, %v29_v14  ;;  %94 = vperm.xlu0 %876, %v52_v19   ;;  %v352_v48 = vld [vmem:[%s1144_s3] sm:$0xff] }
  0x11   :  { %739 = vmatprep.mubr.msk.f32.mxu0 %vm142_vm0, %v30_v16  ;;  %789 = vmatprep.mubr.f32.mxu1 %v352_v48 }
  0x13   :  { %109 = vperm.xlu1 %877, %v55_v25  }
  0x14   :  { %740 = vmatmul.mubr.msk.f32.gmra.mrb[4].mxu0 %vm142_vm0, %v31_v18  ;;  %104 = vperm.xlu0 %876, %v54_v23  }
  0x15   :  { %742 = vmatprep.mubr.msk.f32.mxu0 %vm142_vm0, %v32_v20 }
  0x17   :  { %119 = vperm.xlu1 %877, %v57_v29  }
  0x18   :  { %743 = vmatmul.mubr.msk.f32.gmra.mrb[6].mxu0 %vm142_vm0, %v33_v22  ;;  %114 = vperm.xlu0 %876, %v56_v27  }
  0x19   :  { %745 = vmatprep.mubr.msk.f32.mxu0 %vm142_vm0, %v34_v24 }
  0x1b   :  { %129 = vperm.xlu1 %877, %v59_v33  }
  0x1c   :  { %746 = vmatmul.mubr.msk.f32.gmra.mrb[8].mxu0 %vm142_vm0, %v35_v26  ;;  %124 = vperm.xlu0 %876, %v58_v31  }
  0x1d   :  { %748 = vmatprep.mubr.msk.f32.mxu0 %vm142_vm0, %v36_v28 }
  0x1f   :  { %139 = vperm.xlu1 %877, %v61_v37  }
  0x20   :  { %749 = vmatmul.mubr.msk.f32.gmra.mrb[10].mxu0 %vm142_vm0, %v37_v30  ;;  %134 = vperm.xlu0 %876, %v60_v35  }
  0x21   :  { %751 = vmatprep.mubr.msk.f32.mxu0 %vm142_vm0, %v38_v32 }
  0x23   :  { %375 = vperm.xlu1 %877, %v361_v40  }
  0x24   :  { %752 = vmatmul.mubr.msk.f32.gmra.mrb[12].mxu0 %vm142_vm0, %v39_v34  ;;  %370 = vperm.xlu0 %876, %v360_v39  }
  0x25   :  { %754 = vmatprep.mubr.msk.f32.mxu0 %vm142_vm0, %v40_v36 }
  0x27   :  { %385 = vperm.xlu1 %877, %v363_v42  }
  0x28   :  { %755 = vmatmul.mubr.msk.f32.gmra.mrb[14].mxu0 %vm142_vm0, %v41_v38  ;;  %380 = vperm.xlu0 %876, %v362_v41  }
  0x2b   :  { %395 = vperm.xlu1 %877, %v365_v44  }
  0x2c   :  { %390 = vperm.xlu0 %876, %v364_v43  }
  0x2f   :  { %405 = vperm.xlu1 %877, %v367_v46  }
  0x30   :  { %400 = vperm.xlu0 %876, %v366_v45  }
  0x34   :  { %565 = vperm.xlu0 %876, %v562_v47  }
  0x82   :  { %v75_v49 = vpop.permute.xlu1 %74 }
  0x83   :  { %v65_v50 = vpop.permute.xlu0 %64 }
  0x86   :  { %v80_v51 = vpop.permute.xlu1 %79 }
  0x87   :  { %v70_v52 = vpop.permute.xlu0 %69 }
  0x8a   :  { %v90_v53 = vpop.permute.xlu1 %89 }
  0x8b   :  { %v85_v54 = vpop.permute.xlu0 %84 }
  0x8e   :  { %v100_v60 = vpop.permute.xlu1 %99 }
  0x8f   :  { %v95_v63 = vpop.permute.xlu0 %94 }
  0x92   :  { %v110_v9 = vpop.permute.xlu1 %109 }
  0x93   :  { %v105_v12 = vpop.permute.xlu0 %104 }
  0x96   :  { %v120_v21 = vpop.permute.xlu1 %119 }
  0x97   :  { %v115_v24 = vpop.permute.xlu0 %114 }
  0x9a   :  { %v130_v34 = vpop.permute.xlu1 %129 }
  0x9b   :  { %v125_v37 = vpop.permute.xlu0 %124 }
  0x9e   :  { %v140_v46 = vpop.permute.xlu1 %139 }
  0xdf   :  { %v735_v55 = vpop.f32.mrb[0].mxu0 }
  0xe0   :  { %v263_v56 = vadd.f32 %v735_v55, %v70_v52  ;;  %v257_v57 = vpop.f32.mrb[1].mxu0 }
  0xe1   :  { %v258_v58 = vadd.f32 %v257_v57, %v65_v50  ;;  %v353_v57 = vld [vmem:[%s1144_s3 + $0x8] sm:$0xff] }
  0xe2   :  { %v337_v59 = vmax.f32 %v263_v56, 0.0 }
  0xe3   :  { %v336_v61 = vmax.f32 %v258_v58, 0.0  ;;  %v738_v62 = vpop.f32.mrb[2].mxu0  ;;  %v354_v58 = vld [vmem:[%s1144_s3 + $0x10] sm:$0xff] }
  0xe4   :  { %v273_v0 = vadd.f32 %v738_v62, %v80_v51  ;;  %v267_v1 = vpop.f32.mrb[3].mxu0  ;;  %v358_v62 = vld [vmem:[%s1144_s3 + $0x30] sm:$0xff] }
  0xe5   :  { %v268_v2 = vadd.f32 %v267_v1, %v75_v49  ;;  %v828_v3 = vpack.c.bf16 %v337_v59, %v336_v61  ;;  %v135_v49 = vpop.permute.xlu0 %134  ;;  %v355_v59 = vld [vmem:[%s1144_s3 + $0x18] sm:$0xff]  ;;  %v357_v61 = vld [vmem:[%s1144_s3 + $0x28] sm:$0xff]  ;;  %v913_v1 = vmov 0.0  }
  0xe6   :  { %v339_v4 = vmax.f32 %v273_v0, 0.0  ;;  %v911_v0 = vmov 0.0|0.0   ;;  %817 = vmatprep.mubr.msk.f32.mxu0 %vm912_vm1, %v913_v1 }
  0xe7   :  { %v338_v5 = vmax.f32 %v268_v2, 0.0  ;;  %v741_v6 = vpop.f32.mrb[4].mxu0  ;;  %829 = vmatprep.subr.bf16.mxu1 %v828_v3  ;;  %860 = vmatprep.subr.bf16.mxu0 %v911_v0  ;;  %v376_v2 = vpop.permute.xlu1 %375 }
  0xe8   :  { %v283_v7 = vadd.f32 %v741_v6, %v90_v53  ;;  %v277_v8 = vpop.f32.mrb[5].mxu0  ;;  %831 = vmatpush3.bf16.msra.mxu1 %v828_v3 }
  0xe9   :  { %v832_v10 = vpack.c.bf16 %v339_v4, %v338_v5  ;;  %v278_v11 = vadd.f32 %v277_v8, %v85_v54  ;;  %v371_v3 = vpop.permute.xlu0 %370 }
  0xea   :  { %v341_v13 = vmax.f32 %v283_v7, 0.0 }
  0xeb   :  { %v340_v14 = vmax.f32 %v278_v11, 0.0  ;;  %v744_v15 = vpop.f32.mrb[6].mxu0  ;;  %833 = vmatprep.subr.bf16.mxu1 %v832_v10  ;;  %v386_v4 = vpop.permute.xlu1 %385 }
  0xec   :  { %v293_v16 = vadd.f32 %v744_v15, %v100_v60  ;;  %v287_v17 = vpop.f32.mrb[7].mxu0  ;;  %835 = vmatpush3.bf16.msra.mxu1 %v832_v10  ;;  %v356_v60 = vld [vmem:[%s1144_s3 + $0x20] sm:$0xff] }
  0xed   :  { %v836_v18 = vpack.c.bf16 %v341_v13, %v340_v14  ;;  %v288_v19 = vadd.f32 %v287_v17, %v95_v63  ;;  %v359_v63 = vld [vmem:[%s1144_s3 + $0x38] sm:$0xff]  ;;  %v381_v6 = vpop.permute.xlu0 %380 }
  0xee   :  { %v343_v20 = vmax.f32 %v293_v16, 0.0 }
  0xef   :  { %v342_v22 = vmax.f32 %v288_v19, 0.0  ;;  %v747_v23 = vpop.f32.mrb[8].mxu0  ;;  %837 = vmatprep.subr.bf16.mxu1 %v836_v18  ;;  %v396_v15 = vpop.permute.xlu1 %395 }
  0xf0   :  { %v303_v25 = vadd.f32 %v747_v23, %v110_v9  ;;  %v297_v26 = vpop.f32.mrb[9].mxu0  ;;  %839 = vmatpush3.bf16.msra.mxu1 %v836_v18 }
  0xf1   :  { %v840_v27 = vpack.c.bf16 %v343_v20, %v342_v22  ;;  %v298_v28 = vadd.f32 %v297_v26, %v105_v12  ;;  %v391_v17 = vpop.permute.xlu0 %390 }
  0xf2   :  { %v345_v29 = vmax.f32 %v303_v25, 0.0 }
  0xf3   :  { %v344_v30 = vmax.f32 %v298_v28, 0.0  ;;  %v750_v31 = vpop.f32.mrb[10].mxu0  ;;  %841 = vmatprep.subr.bf16.mxu1 %v840_v27  ;;  %v406_v25 = vpop.permute.xlu1 %405 }
  0xf4   :  { %v313_v32 = vadd.f32 %v750_v31, %v120_v21  ;;  %v307_v33 = vpop.f32.mrb[11].mxu0  ;;  %843 = vmatpush3.bf16.msra.mxu1 %v840_v27 }
  0xf5   :  { %v844_v35 = vpack.c.bf16 %v345_v29, %v344_v30  ;;  %v308_v36 = vadd.f32 %v307_v33, %v115_v24  ;;  %v401_v28 = vpop.permute.xlu0 %400 }
  0xf6   :  { %v347_v38 = vmax.f32 %v313_v32, 0.0 }
  0xf7   :  { %v346_v39 = vmax.f32 %v308_v36, 0.0  ;;  %v753_v40 = vpop.f32.mrb[12].mxu0  ;;  %845 = vmatprep.subr.bf16.mxu1 %v844_v35 }
  0xf8   :  { %v323_v41 = vadd.f32 %v753_v40, %v130_v34  ;;  %v317_v42 = vpop.f32.mrb[13].mxu0  ;;  %847 = vmatpush3.bf16.msra.mxu1 %v844_v35 }
  0xf9   :  { %v848_v43 = vpack.c.bf16 %v347_v38, %v346_v39  ;;  %v318_v44 = vadd.f32 %v317_v42, %v125_v37 }
  0xfa   :  { %v349_v45 = vmax.f32 %v323_v41, 0.0 }
  0xfb   :  { %v348_v47 = vmax.f32 %v318_v44, 0.0  ;;  %v756_v48 = vpop.f32.mrb[14].mxu0  ;;  %849 = vmatprep.subr.bf16.mxu1 %v848_v43 }
  0xfc   :  { %v333_v50 = vadd.f32 %v756_v48, %v140_v46  ;;  %v327_v51 = vpop.f32.mrb[15].mxu0  ;;  %851 = vmatpush3.bf16.msra.mxu1 %v848_v43 }
  0xfd   :  { %v852_v52 = vpack.c.bf16 %v349_v45, %v348_v47  ;;  %v328_v53 = vadd.f32 %v327_v51, %v135_v49 }
  0xfe   :  { %v351_v54 = vmax.f32 %v333_v50, 0.0 }
  0xff   :  { %v350_v55 = vmax.f32 %v328_v53, 0.0  ;;  %853 = vmatprep.subr.bf16.mxu1 %v852_v52 }
 0x100   :  { %855 = vmatpush3.bf16.msra.mxu1 %v852_v52 }
 0x101   :  { %v856_v56 = vpack.c.bf16 %v351_v54, %v350_v55 }
 0x103   :  { %857 = vmatprep.subr.bf16.mxu1 %v856_v56 }
 0x104   :  { %859 = vmatpush3.bf16.msra.mxu1 %v856_v56 }
 0x107   :  { %790 = vmatmul.mubr.f32.vlgmr.msra.gmra.mrb[0].mxu1 %v353_v57 }
 0x108   :  { %792 = vmatprep.mubr.f32.mxu1 %v354_v58 }
 0x10b   :  { %793 = vmatmul.mubr.f32.gmra.mrb[2].mxu1 %v355_v59 }
 0x10c   :  { %795 = vmatprep.mubr.f32.mxu1 %v356_v60 }
 0x10f   :  { %796 = vmatmul.mubr.f32.gmra.mrb[4].mxu1 %v357_v61 }
 0x110   :  { %798 = vmatprep.mubr.f32.mxu1 %v358_v62  ;;  %v561_v62 = vld [vmem:[%s1145_s5] sm:$0xf] }
 0x113   :  { %799 = vmatmul.mubr.f32.gmra.mrb[6].mxu1 %v359_v63  ;;  %v566_v63 = vpop.permute.xlu0 %565 }
 0x1da   :  { %v791_v5 = vpop.f32.mrb[0].mxu1 }
 0x1db   :  { %v480_v7 = vadd.f32 %v791_v5, %v376_v2  ;;  %v474_v8 = vpop.f32.mrb[1].mxu1 }
 0x1dc   :  { %v475_v9 = vadd.f32 %v474_v8, %v371_v3 }
 0x1dd   :  { %v664_v10 = vmul.f32 -1.442695, %v480_v7 }
 0x1de   :  { %v663_v11 = vmul.f32 -1.442695, %v475_v9  ;;  %v794_v12 = vpop.f32.mrb[2].mxu1 }
 0x1df   :  { %878 = vpow2.f32 %v664_v10  ;;  %v490_v13 = vadd.f32 %v794_v12, %v386_v4  ;;  %v484_v14 = vpop.f32.mrb[3].mxu1 }
 0x1e0   :  { %880 = vpow2.f32 %v663_v11  ;;  %v485_v16 = vadd.f32 %v484_v14, %v381_v6 }
 0x1e1   :  { %v666_v18 = vmul.f32 -1.442695, %v490_v13 }
 0x1e2   :  { %v665_v19 = vmul.f32 -1.442695, %v485_v16  ;;  %v797_v20 = vpop.f32.mrb[4].mxu1 }
 0x1e3   :  { %882 = vpow2.f32 %v666_v18  ;;  %v500_v21 = vadd.f32 %v797_v20, %v396_v15  ;;  %v494_v22 = vpop.f32.mrb[5].mxu1 }
 0x1e4   :  { %884 = vpow2.f32 %v665_v19  ;;  %v495_v23 = vadd.f32 %v494_v22, %v391_v17 }
 0x1e5   :  { %v668_v24 = vmul.f32 -1.442695, %v500_v21 }
 0x1e6   :  { %v667_v26 = vmul.f32 -1.442695, %v495_v23  ;;  %v800_v27 = vpop.f32.mrb[6].mxu1 }
 0x1e7   :  { %886 = vpow2.f32 %v668_v24  ;;  %v510_v29 = vadd.f32 %v800_v27, %v406_v25  ;;  %v504_v30 = vpop.f32.mrb[7].mxu1 }
 0x1e8   :  { %888 = vpow2.f32 %v667_v26  ;;  %v505_v31 = vadd.f32 %v504_v30, %v401_v28 }
 0x1e9   :  { %v879_v32 = vpop.eup %878  ;;  %v670_v33 = vmul.f32 -1.442695, %v510_v29 }
 0x1ea   :  { %v881_v34 = vpop.eup %880  ;;  %v538_v35 = vadd.f32 1.0, %v879_v32  ;;  %v669_v36 = vmul.f32 -1.442695, %v505_v31 }
 0x1eb   :  { %v537_v37 = vadd.f32 1.0, %v881_v34  ;;  %890 = vpow2.f32 %v670_v33 }
 0x1ec   :  { %892 = vrcp.f32 %v538_v35 }
 0x1ed   :  { %v883_v38 = vpop.eup %882  ;;  %894 = vrcp.f32 %v537_v37 }
 0x1ee   :  { %v885_v39 = vpop.eup %884  ;;  %v540_v40 = vadd.f32 1.0, %v883_v38  ;;  %896 = vpow2.f32 %v669_v36 }
 0x1ef   :  { %v539_v41 = vadd.f32 1.0, %v885_v39 }
 0x1f0   :  { %898 = vrcp.f32 %v540_v40 }
 0x1f1   :  { %v887_v42 = vpop.eup %886  ;;  %900 = vrcp.f32 %v539_v41 }
 0x1f2   :  { %v889_v43 = vpop.eup %888  ;;  %v542_v44 = vadd.f32 1.0, %v887_v42 }
 0x1f3   :  { %v541_v45 = vadd.f32 1.0, %v889_v43 }
 0x1f4   :  { %902 = vrcp.f32 %v542_v44 }
 0x1f5   :  { %v891_v46 = vpop.eup %890  ;;  %904 = vrcp.f32 %v541_v45 }
 0x1f6   :  { %v893_v47 = vpop.eup %892  ;;  %v544_v48 = vadd.f32 1.0, %v891_v46 }
 0x1f7   :  { %v895_v49 = vpop.eup %894 }
 0x1f8   :  { %v897_v50 = vpop.eup %896  ;;  %v861_v51 = vpack.c.bf16 %v893_v47, %v895_v49  ;;  %906 = vrcp.f32 %v544_v48 }
 0x1f9   :  { %v543_v52 = vadd.f32 1.0, %v897_v50 }
 0x1fa   :  { %v899_v53 = vpop.eup %898  ;;  %862 = vmatpush3.bf16.msra.mxu0 %v861_v51 }
 0x1fb   :  { %v901_v54 = vpop.eup %900  ;;  %908 = vrcp.f32 %v543_v52  ;;  %863 = vmatprep.subr.bf16.mxu0 %v911_v0 }
 0x1fc   :  { %v864_v55 = vpack.c.bf16 %v899_v53, %v901_v54 }
 0x1fe   :  { %v903_v56 = vpop.eup %902  ;;  %865 = vmatpush3.bf16.msra.mxu0 %v864_v55 }
 0x1ff   :  { %v905_v57 = vpop.eup %904  ;;  %866 = vmatprep.subr.bf16.mxu0 %v911_v0 }
 0x200   :  { %v867_v58 = vpack.c.bf16 %v903_v56, %v905_v57 }
 0x202   :  { %868 = vmatpush3.bf16.msra.mxu0 %v867_v58  ;;  %v907_v59 = vpop.eup %906 }
 0x203   :  { %869 = vmatprep.subr.bf16.mxu0 %v911_v0 }
 0x205   :  { %v909_v60 = vpop.eup %908 }
 0x206   :  { %v870_v61 = vpack.c.bf16 %v907_v59, %v909_v60 }
 0x208   :  { %871 = vmatpush3.bf16.msra.mxu0 %v870_v61 }
 0x20b   :  { %818 = vmatmul.mubr.msk.f32.vlgmr.msra.gmra.mrb[16].mxu0 %vm568_vm2, %v561_v62 }
 0x2de   :  { %v638_v1 = vpop.f32.mrb[16].mxu0 }
 0x2df   :  { %v639_v2 = vadd.f32 %v638_v1, %v566_v63  ;;  %v819_v3 = vpop.f32.mrb[17].mxu0 }
 0x2e1   :  { %642 = vst [vmem:[%s1146_s7] sm:$0xf] %v639_v2 }

</bundles_post_ra>
